<compile_context>
chip_gen: v7x
topology: tpu7x:2x2x1
jax: 0.10.0
libtpu: 0.0.40
codegen_flags: <defaults>
</compile_context>

<pallas_src>
import math
import numpy as np
import jax
import jax.numpy as jnp
from jax.experimental import pallas as pl
from jax.experimental.pallas import tpu as pltpu


def _make_kernel(num_mlp, inv_p):
    def kernel(*refs):
        idx = 0
        x_ref = refs[idx]; idx += 1          # (1, C_in, tcol)  native-layout tile
        m_ref = refs[idx]; idx += 1          # (1, 1, tcol)     combined mask per column
        layers = []
        for _ in range(num_mlp):
            layers.append((refs[idx], refs[idx + 1]))   # (c_out, c_prev), (c_out, 1)
            idx += 2
        s_ref = refs[idx]; idx += 1          # (tcol, A)  0/1 anchor-selection matrix
        wrt_ref = refs[idx]; idx += 1        # (out_R+out_T, c_last)  fused head, f32
        brt_ref = refs[idx]; idx += 1        # (out_R+out_T, 1)
        out_ref = refs[idx]; idx += 1        # (1, out_R+out_T, A)
        acc_ref = refs[idx]; idx += 1        # (c_last, A) f32 pooled accumulator

        p_idx = pl.program_id(1)

        @pl.when(p_idx == 0)
        def _init():
            acc_ref[...] = jnp.zeros_like(acc_ref)

        # mask applied on the loaded tile, before bias/ReLU of the first layer
        h = x_ref[0] * m_ref[0]                              # (C_in, tcol)

        # 1x1 conv stack as lane-dense matmuls: W^T (c_out,c_in) @ X (c_in,tcol)
        for w_ref, b_ref in layers:
            h = jnp.dot(w_ref[...], h.astype(w_ref.dtype),
                        preferred_element_type=jnp.float32)  # (c_out, tcol) f32
            h = jnp.maximum(h + b_ref[...], 0.0)

        # partial mean over points: per-anchor column sum via a tiny selection
        # matmul (column j belongs to anchor j % A); kept f32 for accuracy.
        acc_ref[...] += jnp.dot(h, s_ref[...], preferred_element_type=jnp.float32)

        @pl.when(p_idx == pl.num_programs(1) - 1)
        def _finalize():
            pooled = acc_ref[...] * inv_p                    # (c_last, A) mean over P
            y = jnp.dot(wrt_ref[...], pooled,
                        preferred_element_type=jnp.float32) + brt_ref[...]
            out_ref[0] = y.astype(out_ref.dtype)             # (out_R+out_T, A)
    return kernel


def _choose_tcol(n_col, a_dim, per_col_bytes, budget_bytes):
    """Largest column-tile (multiple of lcm(A,128), divisor of P*A) within budget."""
    unit = (128 * a_dim) // math.gcd(128, a_dim)
    max_cols = max(int(budget_bytes // max(per_col_bytes, 1)), 1)
    if n_col <= max_cols or n_col <= unit:
        return n_col                                  # untiled: full block is always legal
    divs = []
    i = 1
    while i * i <= n_col:
        if n_col % i == 0:
            for d in (i, n_col // i):
                if d % unit == 0:
                    divs.append(d)
        i += 1
    if not divs:
        return n_col                                  # no aligned divisor; fall back to full
    fitting = [d for d in divs if d <= max_cols]
    return max(fitting) if fitting else min(divs)


def so3_outblock_with_mask(x_feats, mask, soft_mask, mlp_params, wR, bR, wT, bT,
                           *, tcol=None, compute_dtype=None,
                           vmem_budget_bytes=6 << 20, vmem_limit_bytes=None,
                           batch_core_parallel=False):
    """x_feats: (B, C_in, P, A) in its native PyTorch layout. mask/soft_mask: (B, P).

    mlp_params: list of (w, b) with w:(c_in, c_out), b:(1, c_out).
    wR/wT: (c_last, out_R/out_T); bR/bT: (1, out_R/out_T).
    compute_dtype: matmul input dtype (default = x dtype); bf16 recommended at
    production sizes on v6e/v7x — pass x_feats already in bf16 to also halve
    the dominant HBM stream (no wrapper-side cast/copy is done here).
    """
    B, C_in, P, A = x_feats.shape
    f32 = jnp.float32
    if compute_dtype is None:
        compute_dtype = x_feats.dtype
    n_col = P * A

    # Free collapse of the native layout (no transpose, no mask materialization
    # of the big tensor).  The combined per-point mask is expanded only to one
    # value per (point, anchor) column so it broadcasts in-kernel with no
    # lane-split relayout; this stream is 1/C_in of the feature stream.
    x2d = x_feats.reshape(B, C_in, n_col)
    cm = mask.astype(f32) * soft_mask.astype(f32)                         # (B, P)
    cm_rep = jnp.broadcast_to(cm[:, :, None], (B, P, A)).reshape(B, 1, n_col)

    c_list = [w.shape[1] for (w, _) in mlp_params]
    c_last = c_list[-1]
    out_R, out_T = wR.shape[1], wT.shape[1]
    out_RT = out_R + out_T

    # VMEM-budget-driven column tile (x double-buffer + mask + sel + f32 live
    # intermediates per column).  TODO(synk): bf16 sublane packing would prefer
    # C_in padded to 16, but that would re-materialize x; accept half-packed rows.
    x_bytes = np.dtype(x_feats.dtype).itemsize
    per_col = (2 * C_in * x_bytes + 2 * 4 + 2 * A * 4
               + 4 * (C_in + sum(c_list)))
    if tcol is None:
        tcol = _choose_tcol(n_col, A, per_col, vmem_budget_bytes)
    assert n_col % tcol == 0 and tcol % A == 0
    assert tcol % 128 == 0 or tcol == n_col
    num_ct = n_col // tcol

    # 0/1 anchor-selection matrix (tile-invariant because tcol % A == 0).
    sel = jnp.asarray(
        (np.arange(tcol)[:, None] % A == np.arange(A)[None, :]).astype(np.float32))

    const = lambda a: pl.BlockSpec(a.shape, lambda b, p: (0,) * a.ndim)
    in_specs = [pl.BlockSpec((1, C_in, tcol), lambda b, p: (b, 0, p)),
                pl.BlockSpec((1, 1, tcol), lambda b, p: (b, 0, p))]
    weight_args = []
    for (w, bb) in mlp_params:
        w_t = jnp.asarray(w).T.astype(compute_dtype)          # (c_out, c_prev)
        b_c = jnp.asarray(bb).reshape(-1, 1).astype(f32)      # (c_out, 1)
        weight_args += [w_t, b_c]
        in_specs += [const(w_t), const(b_c)]
    # Fused R|T head kept in f32 (tiny; preserves precision of the pooled mean).
    wrt_t = jnp.concatenate([jnp.asarray(wR), jnp.asarray(wT)], axis=1).T.astype(f32)
    brt_c = jnp.concatenate([jnp.asarray(bR), jnp.asarray(bT)], axis=1).reshape(-1, 1).astype(f32)
    in_specs += [const(sel), const(wrt_t), const(brt_c)]

    out_specs = pl.BlockSpec((1, out_RT, A), lambda b, p: (b, 0, 0))
    out_shape = jax.ShapeDtypeStruct((B, out_RT, A), f32)

    if vmem_limit_bytes is None:
        w_elems = sum(int(np.prod(a.shape)) for a in weight_args) \
                  + int(np.prod(wrt_t.shape)) + int(np.prod(brt_c.shape))
        est = (per_col * tcol + 4 * c_last * A + 2 * 4 * w_elems
               + 2 * out_RT * max(A, 128) * 4)
        vmem_limit_bytes = int(min(max(2 * est + (2 << 20), 8 << 20), 60 << 20))

    # TODO(synk): if B == 1 on v7x, split the point reduction across the 2 TCs
    # with per-core partial accumulators instead of batch-parallel sharding.
    batch_sem = pltpu.CORE_PARALLEL if batch_core_parallel else "parallel"

    kernel = _make_kernel(len(mlp_params), 1.0 / float(P))

    y = pl.pallas_call(
        kernel,
        grid=(B, num_ct),
        in_specs=in_specs,
        out_specs=out_specs,
        out_shape=out_shape,
        scratch_shapes=[pltpu.VMEM((c_last, A), f32)],
        compiler_params=pltpu.CompilerParams(
            dimension_semantics=(batch_sem, "arbitrary"),
            vmem_limit_bytes=vmem_limit_bytes),
    )(x2d, cm_rep, *weight_args, sel, wrt_t, brt_c)

    # Output is already (B, channels, A) like the PyTorch Conv1d outputs.
    return {"R": y[:, :out_R, :], "T": y[:, out_R:, :]}


def _reference(x_feats, mask, soft_mask, mlp_params, wR, bR, wT, bT):
    x = x_feats * mask[:, None, :, None] * soft_mask[:, None, :, None]
    for (w, b) in mlp_params:  # w: (c_in, c_out), b: (1, c_out)
        x = jnp.einsum("bcpa,cd->bdpa", x, w) + b.reshape(1, -1, 1, 1)
        x = jnp.maximum(x, 0.0)
    pooled = x.mean(axis=2)                                   # (B, C, A)
    R = jnp.einsum("bca,cd->bda", pooled, wR) + bR.reshape(1, -1, 1)
    T = jnp.einsum("bca,cd->bda", pooled, wT) + bT.reshape(1, -1, 1)
    return {"R": R, "T": T}


if __name__ == "__main__":
    # module config (small): params = {'dim_in': 8, 'mlp': [32, 32], 'kanchor': 4}
    # norm=None, pooling_method='mean', pred_t=True, num_heads=1, representation='quat'
    B, C_in, A = 2, 8, 4
    mlp = [32, 32]
    out_R, out_T = 4, 3  # quat, 3*num_heads

    key = jax.random.PRNGKey(0)
    keys = jax.random.split(key, 20)
    ki = iter(range(20))

    # deterministic parameter init (weights stored as (c_in, c_out))
    mlp_params = []
    c_prev = C_in
    for c in mlp:
        w = jax.random.normal(keys[next(ki)], (c_prev, c), dtype=jnp.float32) * 0.1
        b = jax.random.normal(keys[next(ki)], (1, c), dtype=jnp.float32) * 0.1
        mlp_params.append((w, b))
        c_prev = c
    wR = jax.random.normal(keys[next(ki)], (c_prev, out_R), dtype=jnp.float32) * 0.1
    bR = jax.random.normal(keys[next(ki)], (1, out_R), dtype=jnp.float32) * 0.1
    wT = jax.random.normal(keys[next(ki)], (c_prev, out_T), dtype=jnp.float32) * 0.1
    bT = jax.random.normal(keys[next(ki)], (1, out_T), dtype=jnp.float32) * 0.1

    # --- Test 1: small P, single column tile (f32) ---
    P1 = 16
    x1 = jax.random.normal(keys[next(ki)], (B, C_in, P1, A), dtype=jnp.float32)
    m1 = (jax.random.uniform(keys[next(ki)], (B, P1)) > 0.3).astype(jnp.float32)
    s1 = jax.random.uniform(keys[next(ki)], (B, P1), dtype=jnp.float32)
    out1 = so3_outblock_with_mask(x1, m1, s1, mlp_params, wR, bR, wT, bT)
    jax.block_until_ready(out1["R"]); jax.block_until_ready(out1["T"])
    ref1 = _reference(x1, m1, s1, mlp_params, wR, bR, wT, bT)
    assert np.allclose(np.asarray(out1["R"]), np.asarray(ref1["R"]), rtol=1e-4, atol=1e-5)
    assert np.allclose(np.asarray(out1["T"]), np.asarray(ref1["T"]), rtol=1e-4, atol=1e-5)

    # --- Test 2: larger P, forced multi-tile accumulation over the point axis (f32) ---
    P2 = 128
    x2 = jax.random.normal(keys[next(ki)], (B, C_in, P2, A), dtype=jnp.float32)
    m2 = (jax.random.uniform(keys[next(ki)], (B, P2)) > 0.3).astype(jnp.float32)
    s2 = jax.random.uniform(keys[next(ki)], (B, P2), dtype=jnp.float32)
    out2 = so3_outblock_with_mask(x2, m2, s2, mlp_params, wR, bR, wT, bT, tcol=128)
    jax.block_until_ready(out2["R"]); jax.block_until_ready(out2["T"])
    ref2 = _reference(x2, m2, s2, mlp_params, wR, bR, wT, bT)
    assert np.allclose(np.asarray(out2["R"]), np.asarray(ref2["R"]), rtol=1e-4, atol=1e-5)
    assert np.allclose(np.asarray(out2["T"]), np.asarray(ref2["T"]), rtol=1e-4, atol=1e-5)

    # --- Test 3: bf16 feature stream + bf16 matmuls (f32 accumulation), loose tolerance ---
    out3 = so3_outblock_with_mask(x2.astype(jnp.bfloat16), m2, s2, mlp_params,
                                  wR, bR, wT, bT, tcol=128,
                                  compute_dtype=jnp.bfloat16)
    jax.block_until_ready(out3["R"]); jax.block_until_ready(out3["T"])
    assert np.allclose(np.asarray(out3["R"]), np.asarray(ref2["R"]), rtol=5e-2, atol=1e-2)
    assert np.allclose(np.asarray(out3["T"]), np.asarray(ref2["T"]), rtol=5e-2, atol=1e-2)

    # TODO(synk): pooling_method='pointnet' (sptk.PointnetSO3Conv), 'max' pooling,
    # and the optional BatchNorm2d branch are not implemented; defaults
    # (mean pooling, norm=None) are.
    print("KERNEL_OK")
</pallas_src>

<mosaic_0001>
module attributes {stable_mosaic.version = 11 : i64} {
  func.func @kernel(%arg0: i32, %arg1: i32, %arg2: memref<1x8x64xf32, #tpu.memory_space<vmem>>, %arg3: memref<1x1x64xf32, #tpu.memory_space<vmem>>, %arg4: memref<32x8xf32, #tpu.memory_space<vmem>>, %arg5: memref<32x1xf32, #tpu.memory_space<vmem>>, %arg6: memref<32x32xf32, #tpu.memory_space<vmem>>, %arg7: memref<32x1xf32, #tpu.memory_space<vmem>>, %arg8: memref<64x4xf32, #tpu.memory_space<vmem>>, %arg9: memref<7x32xf32, #tpu.memory_space<vmem>>, %arg10: memref<7x1xf32, #tpu.memory_space<vmem>>, %arg11: memref<1x7x4xf32, #tpu.memory_space<vmem>>, %arg12: memref<32x4xf32, #tpu.memory_space<vmem>>) attributes {dimension_semantics = [#tpu.dimension_semantics<parallel>, #tpu.dimension_semantics<arbitrary>], iteration_bounds = array<i64: 2, 1>, scalar_prefetch = 0 : i64, scratch_operands = 1 : i64, tpu.core_type = #tpu.core_type<tc>, window_params = [{transform_indices = @transform_0, window_bounds = array<i64: 1, 8, 64>}, {transform_indices = @transform_1, window_bounds = array<i64: 1, 1, 64>}, {pipeline_mode = #tpu.pipeline_mode<synchronous>, transform_indices = @transform_2, window_bounds = array<i64: 32, 8>}, {pipeline_mode = #tpu.pipeline_mode<synchronous>, transform_indices = @transform_3, window_bounds = array<i64: 32, 1>}, {pipeline_mode = #tpu.pipeline_mode<synchronous>, transform_indices = @transform_4, window_bounds = array<i64: 32, 32>}, {pipeline_mode = #tpu.pipeline_mode<synchronous>, transform_indices = @transform_5, window_bounds = array<i64: 32, 1>}, {pipeline_mode = #tpu.pipeline_mode<synchronous>, transform_indices = @transform_6, window_bounds = array<i64: 64, 4>}, {pipeline_mode = #tpu.pipeline_mode<synchronous>, transform_indices = @transform_7, window_bounds = array<i64: 7, 32>}, {pipeline_mode = #tpu.pipeline_mode<synchronous>, transform_indices = @transform_8, window_bounds = array<i64: 7, 1>}, {transform_indices = @transform_9, window_bounds = array<i64: 1, 7, 4>}]} {
    %c0_i32 = arith.constant 0 : i32
    %0 = arith.cmpi eq, %arg1, %c0_i32 : i32
    %1 = arith.extui %0 : i1 to i32
    %c0_i32_0 = arith.constant 0 : i32
    %2 = arith.cmpi ne, %1, %c0_i32_0 : i32
    scf.if %2 {
      %cst_26 = arith.constant 0.000000e+00 : f32
      %31 = vector.broadcast %cst_26 : f32 to vector<32x4xf32>
      %c0_27 = arith.constant 0 : index
      %c0_28 = arith.constant 0 : index
      %32 = vector.load %arg12[%c0_27, %c0_28] : memref<32x4xf32, #tpu.memory_space<vmem>>, vector<32x4xf32>
      tpu.vector_store %arg12[%c0_27, %c0_28], %31 {strides = array<i32>} : memref<32x4xf32, #tpu.memory_space<vmem>>, vector<32x4xf32>,
    } else {
    }
    %c0 = arith.constant 0 : index
    %c0_1 = arith.constant 0 : index
    %c0_2 = arith.constant 0 : index
    %3 = vector.load %arg2[%c0, %c0_1, %c0_2] : memref<1x8x64xf32, #tpu.memory_space<vmem>>, vector<1x8x64xf32>
    %4 = vector.shape_cast %3 : vector<1x8x64xf32> to vector<8x64xf32>
    %c0_3 = arith.constant 0 : index
    %c0_4 = arith.constant 0 : index
    %c0_5 = arith.constant 0 : index
    %5 = vector.load %arg3[%c0_3, %c0_4, %c0_5] : memref<1x1x64xf32, #tpu.memory_space<vmem>>, vector<1x1x64xf32>
    %6 = vector.shape_cast %5 : vector<1x1x64xf32> to vector<1x64xf32>
    %7 = vector.broadcast %6 : vector<1x64xf32> to vector<8x64xf32>
    %8 = arith.mulf %4, %7 : vector<8x64xf32>
    %c0_6 = arith.constant 0 : index
    %c0_7 = arith.constant 0 : index
    %9 = vector.load %arg4[%c0_6, %c0_7] : memref<32x8xf32, #tpu.memory_space<vmem>>, vector<32x8xf32>
    %cst = arith.constant dense<0.000000e+00> : vector<32x64xf32>
    %10 = tpu.matmul %9, %8, %cst {dimension_numbers = #tpu.dot_dimension_numbers<[1], [0], [0], [1], [0, 0, 1, 1], [], []>} : vector<32x8xf32>, vector<8x64xf32>, vector<32x64xf32> -> vector<32x64xf32>
    %c0_8 = arith.constant 0 : index
    %c0_9 = arith.constant 0 : index
    %11 = vector.load %arg5[%c0_8, %c0_9] : memref<32x1xf32, #tpu.memory_space<vmem>>, vector<32x1xf32>
    %12 = vector.broadcast %11 : vector<32x1xf32> to vector<32x64xf32>
    %13 = arith.addf %10, %12 : vector<32x64xf32>
    %cst_10 = arith.constant 0.000000e+00 : f32
    %14 = vector.broadcast %cst_10 : f32 to vector<32x64xf32>
    %15 = arith.maximumf %13, %14 : vector<32x64xf32>
    %c0_11 = arith.constant 0 : index
    %c0_12 = arith.constant 0 : index
    %16 = vector.load %arg6[%c0_11, %c0_12] : memref<32x32xf32, #tpu.memory_space<vmem>>, vector<32x32xf32>
    %cst_13 = arith.constant dense<0.000000e+00> : vector<32x64xf32>
    %17 = tpu.matmul %16, %15, %cst_13 {dimension_numbers = #tpu.dot_dimension_numbers<[1], [0], [0], [1], [0, 0, 1, 1], [], []>} : vector<32x32xf32>, vector<32x64xf32>, vector<32x64xf32> -> vector<32x64xf32>
    %c0_14 = arith.constant 0 : index
    %c0_15 = arith.constant 0 : index
    %18 = vector.load %arg7[%c0_14, %c0_15] : memref<32x1xf32, #tpu.memory_space<vmem>>, vector<32x1xf32>
    %19 = vector.broadcast %18 : vector<32x1xf32> to vector<32x64xf32>
    %20 = arith.addf %17, %19 : vector<32x64xf32>
    %cst_16 = arith.constant 0.000000e+00 : f32
    %21 = vector.broadcast %cst_16 : f32 to vector<32x64xf32>
    %22 = arith.maximumf %20, %21 : vector<32x64xf32>
    %c0_17 = arith.constant 0 : index
    %c0_18 = arith.constant 0 : index
    %23 = vector.load %arg12[%c0_17, %c0_18] : memref<32x4xf32, #tpu.memory_space<vmem>>, vector<32x4xf32>
    %c0_19 = arith.constant 0 : index
    %c0_20 = arith.constant 0 : index
    %24 = vector.load %arg8[%c0_19, %c0_20] : memref<64x4xf32, #tpu.memory_space<vmem>>, vector<64x4xf32>
    %cst_21 = arith.constant dense<0.000000e+00> : vector<32x4xf32>
    %25 = tpu.matmul %22, %24, %cst_21 {dimension_numbers = #tpu.dot_dimension_numbers<[1], [0], [0], [1], [0, 0, 1, 1], [], []>} : vector<32x64xf32>, vector<64x4xf32>, vector<32x4xf32> -> vector<32x4xf32>
    %26 = arith.addf %23, %25 : vector<32x4xf32>
    %c0_22 = arith.constant 0 : index
    %c0_23 = arith.constant 0 : index
    %27 = vector.load %arg12[%c0_22, %c0_23] : memref<32x4xf32, #tpu.memory_space<vmem>>, vector<32x4xf32>
    tpu.vector_store %arg12[%c0_22, %c0_23], %26 {strides = array<i32>} : memref<32x4xf32, #tpu.memory_space<vmem>>, vector<32x4xf32>,
    %c0_i32_24 = arith.constant 0 : i32
    %28 = arith.cmpi eq, %arg1, %c0_i32_24 : i32
    %29 = arith.extui %28 : i1 to i32
    %c0_i32_25 = arith.constant 0 : i32
    %30 = arith.cmpi ne, %29, %c0_i32_25 : i32
    scf.if %30 {
      %c0_26 = arith.constant 0 : index
      %c0_27 = arith.constant 0 : index
      %31 = vector.load %arg12[%c0_26, %c0_27] : memref<32x4xf32, #tpu.memory_space<vmem>>, vector<32x4xf32>
      %cst_28 = arith.constant 6.250000e-02 : f32
      %32 = vector.broadcast %cst_28 : f32 to vector<32x4xf32>
      %33 = arith.mulf %31, %32 : vector<32x4xf32>
      %c0_29 = arith.constant 0 : index
      %c0_30 = arith.constant 0 : index
      %34 = vector.load %arg9[%c0_29, %c0_30] : memref<7x32xf32, #tpu.memory_space<vmem>>, vector<7x32xf32>
      %cst_31 = arith.constant dense<0.000000e+00> : vector<7x4xf32>
      %35 = tpu.matmul %34, %33, %cst_31 {dimension_numbers = #tpu.dot_dimension_numbers<[1], [0], [0], [1], [0, 0, 1, 1], [], []>} : vector<7x32xf32>, vector<32x4xf32>, vector<7x4xf32> -> vector<7x4xf32>
      %c0_32 = arith.constant 0 : index
      %c0_33 = arith.constant 0 : index
      %36 = vector.load %arg10[%c0_32, %c0_33] : memref<7x1xf32, #tpu.memory_space<vmem>>, vector<7x1xf32>
      %37 = vector.broadcast %36 : vector<7x1xf32> to vector<7x4xf32>
      %38 = arith.addf %35, %37 : vector<7x4xf32>
      %c0_34 = arith.constant 0 : index
      %c0_35 = arith.constant 0 : index
      %c0_36 = arith.constant 0 : index
      %39 = vector.load %arg11[%c0_34, %c0_35, %c0_36] : memref<1x7x4xf32, #tpu.memory_space<vmem>>, vector<1x7x4xf32>
      %40 = vector.shape_cast %39 : vector<1x7x4xf32> to vector<7x4xf32>
      %41 = vector.shape_cast %38 : vector<7x4xf32> to vector<1x7x4xf32>
      tpu.vector_store %arg11[%c0_34, %c0_35, %c0_36], %41 {strides = array<i32>} : memref<1x7x4xf32, #tpu.memory_space<vmem>>, vector<1x7x4xf32>,
    } else {
    }
    return
  }
  func.func @transform_0(%arg0: i32, %arg1: i32) -> (i32, i32, i32) {
    %c0_i32 = arith.constant 0 : i32
    %c0_i32_0 = arith.constant 0 : i32
    return %arg0, %c0_i32, %arg1 : i32, i32, i32
  }
  func.func @transform_1(%arg0: i32, %arg1: i32) -> (i32, i32, i32) {
    %c0_i32 = arith.constant 0 : i32
    %c0_i32_0 = arith.constant 0 : i32
    return %arg0, %c0_i32, %arg1 : i32, i32, i32
  }
  func.func @transform_2(%arg0: i32, %arg1: i32) -> (i32, i32) {
    %c0_i32 = arith.constant 0 : i32
    %c0_i32_0 = arith.constant 0 : i32
    %c0_i32_1 = arith.constant 0 : i32
    return %c0_i32, %c0_i32_0 : i32, i32
  }
  func.func @transform_3(%arg0: i32, %arg1: i32) -> (i32, i32) {
    %c0_i32 = arith.constant 0 : i32
    %c0_i32_0 = arith.constant 0 : i32
    %c0_i32_1 = arith.constant 0 : i32
    return %c0_i32, %c0_i32_0 : i32, i32
  }
  func.func @transform_4(%arg0: i32, %arg1: i32) -> (i32, i32) {
    %c0_i32 = arith.constant 0 : i32
    %c0_i32_0 = arith.constant 0 : i32
    %c0_i32_1 = arith.constant 0 : i32
    return %c0_i32, %c0_i32_0 : i32, i32
  }
  func.func @transform_5(%arg0: i32, %arg1: i32) -> (i32, i32) {
    %c0_i32 = arith.constant 0 : i32
    %c0_i32_0 = arith.constant 0 : i32
    %c0_i32_1 = arith.constant 0 : i32
    return %c0_i32, %c0_i32_0 : i32, i32
  }
  func.func @transform_6(%arg0: i32, %arg1: i32) -> (i32, i32) {
    %c0_i32 = arith.constant 0 : i32
    %c0_i32_0 = arith.constant 0 : i32
    %c0_i32_1 = arith.constant 0 : i32
    return %c0_i32, %c0_i32_0 : i32, i32
  }
  func.func @transform_7(%arg0: i32, %arg1: i32) -> (i32, i32) {
    %c0_i32 = arith.constant 0 : i32
    %c0_i32_0 = arith.constant 0 : i32
    %c0_i32_1 = arith.constant 0 : i32
    return %c0_i32, %c0_i32_0 : i32, i32
  }
  func.func @transform_8(%arg0: i32, %arg1: i32) -> (i32, i32) {
    %c0_i32 = arith.constant 0 : i32
    %c0_i32_0 = arith.constant 0 : i32
    %c0_i32_1 = arith.constant 0 : i32
    return %c0_i32, %c0_i32_0 : i32, i32
  }
  func.func @transform_9(%arg0: i32, %arg1: i32) -> (i32, i32, i32) {
    %c0_i32 = arith.constant 0 : i32
    %c0_i32_0 = arith.constant 0 : i32
    %c0_i32_1 = arith.constant 0 : i32
    return %arg0, %c0_i32, %c0_i32_0 : i32, i32, i32
  }
}

</mosaic_0001>

<bundles_post_ra>
// kernel: tpu_custom_call.1
= control target key start
LH: loop header
LB: loop body
LE: loop exit
PB: predicated region body
PF: predicated region fallthrough
CT: control target
= control target key end

     0   :  { %s1188_s30 = smov 0   ;;  %s1190_s10 = smov 0   ;;  %s1327_s0 = inlined_call_operand.vmem [shape: f32[2,8,64], index: 0, kind: input, shape index: {}]   ;;  %s1328_s1 = inlined_call_operand.vmem [shape: f32[2,1,64], index: 1, kind: input, shape index: {}]   ;;  %s1329_s2 = inlined_call_operand.vmem [shape: f32[32,8], index: 2, kind: input, shape index: {}]   ;;  %s1330_s3 = inlined_call_operand.vmem [shape: f32[32,1], index: 3, kind: input, shape index: {}]   ;;  %s1331_s4 = inlined_call_operand.vmem [shape: f32[32,32], index: 4, kind: input, shape index: {}]   ;;  %s1332_s5 = inlined_call_operand.vmem [shape: f32[32,1], index: 5, kind: input, shape index: {}]   ;;  %s1333_s6 = inlined_call_operand.vmem [shape: f32[64,4], index: 6, kind: input, shape index: {}]   ;;  %s1334_s7 = inlined_call_operand.vmem [shape: f32[7,32], index: 7, kind: input, shape index: {}]   ;;  %s1335_s8 = inlined_call_operand.vmem [shape: f32[7,1], index: 8, kind: input, shape index: {}]   ;;  %s1336_s9 = inlined_call_operand.vmem [shape: f32[2,7,4], index: 9, kind: output, shape index: {}]  }
   0x1   :  { %s1192_s11 = smov 0  }
   0x2 LB: > { %s31_s12 = sadd.s32 1, %s1128_s10  ;;  %p946_p0 = scmp.ge.s32.totalorder %s1132_s11, 1  ;;  %s1132_s11 = sphi %s1192_s11, %s19_s11   ;;  %s1128_s10 = sphi %s1190_s10, %s1338_s10   ;;  %s1124_s30 = sphi %s1188_s30, %s1337_s30  }
   0x3   : > { %p33_p1 = scmp.ge.s32.totalorder %s31_s12, 2  ;;  %p316_p2 = scmp.lt.s32.totalorder %s1132_s11, 3 }
   0x5   : > { %s1340_s12 = smov (%p33_p1, %s31_s12), 0  ;;  %p317_p3 = pnand %p946_p0, %p316_p2 }
   0x6   : > { %p359_p4 = scmp.lt.s32.totalorder (!%p317_p3), %s1124_s30, 1  ;;  %v394_v0 = vld [vmem:[%s1329_s2] sm:$0xff] (!%p317_p3)  ;;  %vm422_vm0 = vcmask (!%p317_p3), 64512   ;;  %v1134_v1 = vmov (!%p317_p3), 0   ;;  %v400_v3 = vld [vmem:[%s1330_s3 + $0x10] sm:$0xff] (!%p317_p3)  ;;  %v399_v4 = vld [vmem:[%s1330_s3 + $0x8] sm:$0xff] (!%p317_p3) }
   0x7   : > { %320 = sbr.rel (%p317_p3) target bundleno = 916 (0x394), region = 56  ;;  %997 = vmatprep.mubr.msk.f32.mxu1 (!%p317_p3), %vm422_vm0, %v394_v0  ;;  %1108 = vset.pattern.permute.xlu0 (!%p317_p3), %v1134_v1  ;;  %v398_v2 = vld [vmem:[%s1330_s3] sm:$0xff] (!%p317_p3)  ;;  %v401_v5 = vld [vmem:[%s1330_s3 + $0x18] sm:$0xff] (!%p317_p3)  ;;  %v395_v10 = vld [vmem:[%s1329_s2 + $0x8] sm:$0xff] (!%p317_p3)  ;;  %vm552_vm1 = vcmask (!%p317_p3), 261120   ;;  %vm380_vm2 = vcmask (!%p317_p3), 31744  }
   0x8   : > { %404 = vperm.xlu0 (!%p317_p3), %1108, %v398_v2   ;;  %1109 = vset.pattern.permute.xlu1 (!%p317_p3), %v1134_v1  ;;  %v528_v9 = vld [vmem:[%s1332_s5] sm:$0xff] (!%p317_p3)  ;;  %v529_v11 = vld [vmem:[%s1332_s5 + $0x8] sm:$0xff] (!%p317_p3)  ;;  %v396_v12 = vld [vmem:[%s1329_s2 + $0x10] sm:$0xff] (!%p317_p3)  ;;  %v1135_v51 = vmov (!%p317_p3), 0.0   ;;  %vm666_vm3 = vcmask (!%p317_p3), 523264   ;;  %vm1137_vm4 = vmmov (!%p317_p3), 0  }
   0x9   : > { %414 = vperm.xlu1 (!%p317_p3), %1109, %v400_v3   ;;  %v530_v13 = vld [vmem:[%s1332_s5 + $0x10] sm:$0xff] (!%p317_p3)  ;;  %v397_v14 = vld [vmem:[%s1329_s2 + $0x18] sm:$0xff] (!%p317_p3)  ;;  %v785_v16 = vld [vmem:[%s1335_s8] sm:$0x7f] (!%p317_p3)  ;;  %382 = vst.msk [vmem:[#allocation2 + $0x8] sm:$0xff] (!%p317_p3), %vm380_vm2, %v1135_v51  ;;  %vm864_vm5 = vcmask (!%p317_p3), 30720  }
   0xa   : > { %v531_v15 = vld [vmem:[%s1332_s5 + $0x18] sm:$0xff] (!%p317_p3)  ;;  %v524_v17 = vld [vmem:[%s1331_s4] sm:$0xff] (!%p317_p3)  ;;  %v659_v19 = vld [vmem:[%s1333_s6 + $0x8] sm:$0xff] (!%p317_p3)  ;;  %381 = vst.msk [vmem:[#allocation2] sm:$0xff] (!%p317_p3), %vm380_vm2, %v1135_v51 }
   0xb   : > { %v658_v18 = vld [vmem:[%s1333_s6] sm:$0xff] (!%p317_p3)  ;;  %v660_v20 = vld [vmem:[%s1333_s6 + $0x10] sm:$0xff] (!%p317_p3)  ;;  %v661_v22 = vld [vmem:[%s1333_s6 + $0x18] sm:$0xff] (!%p317_p3)  ;;  %383 = vst.msk [vmem:[#allocation2 + $0x10] sm:$0xff] (!%p317_p3), %vm380_vm2, %v1135_v51 }
   0xc   : > { %409 = vperm.xlu0 (!%p317_p3), %1108, %v399_v4   ;;  %v1058_v21 = vpack.c.bf16 (!%p317_p3), %v659_v19, %v658_v18  ;;  %v1062_v23 = vpack.c.bf16 (!%p317_p3), %v661_v22, %v660_v20  ;;  %v662_v24 = vld [vmem:[%s1333_s6 + $0x20] sm:$0xff] (!%p317_p3)  ;;  %v663_v25 = vld [vmem:[%s1333_s6 + $0x28] sm:$0xff] (!%p317_p3)  ;;  %v526_v46 = vld [vmem:[%s1331_s4 + $0x10] sm:$0xff] (!%p317_p3)  ;;  %384 = vst.msk [vmem:[#allocation2 + $0x18] sm:$0xff] (!%p317_p3), %vm380_vm2, %v1135_v51  ;;  %v1136_v4 = vmov (!%p317_p3), 0.0|0.0  }
   0xd   : > { %419 = vperm.xlu1 (!%p317_p3), %1109, %v401_v5   ;;  %v1066_v26 = vpack.c.bf16 (!%p317_p3), %v663_v25, %v662_v24  ;;  %v525_v45 = vld [vmem:[%s1331_s4 + $0x8] sm:$0xff] (!%p317_p3)  ;;  %v527_v47 = vld [vmem:[%s1331_s4 + $0x18] sm:$0xff] (!%p317_p3)  ;;  %v664_v48 = vld [vmem:[%s1333_s6 + $0x30] sm:$0xff] (!%p317_p3) }
   0xe   : > { %s1342_s30 = smov (!%p359_p4, %s1124_s30), 1  ;;  %1059 = vmatprep.subr.bf16.mxu0 %v1058_v21  ;;  %v665_v49 = vld [vmem:[%s1333_s6 + $0x38] sm:$0xff] }
   0xf   : > { %s947_s21 = sshll.u32 %s1342_s30, 3  ;;  %s371_s24 = scalar_lea.vmem %s1328_s1, %s1342_s30  ;;  %1061 = vmatpush3.bf16.msra.mxu0 %v1058_v21  ;;  %v1070_v50 = vpack.c.bf16 %v665_v49, %v664_v48 }
  0x10   : > { %s365_s29 = scalar_lea.vmem %s1327_s0, %s947_s21  ;;  %v949_v6 = vld [vmem:[%s371_s24] ss:$0 sm:$0xff]  ;;  %534 = vperm.xlu0 %1108, %v528_v9   ;;  %1063 = vmatprep.subr.bf16.mxu0 %v1062_v23  ;;  %v655_v5 = vld [vmem:[#allocation2 + $0x8] sm:$0xff]  ;;  %s375_s26 = scalar_lea.vmem %s1336_s9, %s947_s21 }
  0x11   : > { %v385_v7 = vld [vmem:[%s365_s29] sm:$0xff]  ;;  %539 = vperm.xlu1 %1109, %v529_v11  }
  0x12   : > { %v393_v8 = vmul.f32 %v949_v6, %v385_v7  ;;  %v654_v6 = vld [vmem:[#allocation2] sm:$0xff] }
  0x13   : > { %1065 = vmatpush3.bf16.msra.mxu0 %v1062_v23  ;;  %v657_v11 = vld [vmem:[#allocation2 + $0x18] sm:$0xff] }
  0x14   : > { %995 = vmatprep.subr.mxu1 %v393_v8  ;;  %544 = vperm.xlu0 %1108, %v530_v13  }
  0x15   : > { %996 = vmatpush3.msra.mxu1 %v393_v8  ;;  %549 = vperm.xlu1 %1109, %v531_v15  }
  0x16   : > { %998 = vmatmul.mubr.msk.f32.vlgmr.msra.gmra.mrb[0].mxu1 %vm422_vm0, %v395_v10  ;;  %1067 = vmatprep.subr.bf16.mxu0 %v1066_v26 }
  0x17   : > { %1000 = vmatprep.mubr.msk.f32.mxu1 %vm422_vm0, %v396_v12  ;;  %1069 = vmatpush3.bf16.msra.mxu0 %v1066_v26  ;;  %v656_v12 = vld [vmem:[#allocation2 + $0x10] sm:$0xff] }
  0x18   : > { %788 = vperm.xlu0 %1108, %v785_v16   ;;  %1071 = vmatprep.subr.bf16.mxu0 %v1070_v50 }
  0x1a   : > { %1001 = vmatmul.mubr.msk.f32.gmra.mrb[2].mxu1 %vm422_vm0, %v397_v14 }
  0x1b   : > { %1011 = vmatprep.mubr.msk.f32.mxu1 %vm552_vm1, %v524_v17  ;;  %1073 = vmatpush3.bf16.msra.mxu0 %v1070_v50 }
  0x87   : > { %v405_v27 = vpop.permute.xlu0 %404 }
  0x88   : > { %v415_v28 = vpop.permute.xlu1 %414 }
  0x8b   : > { %v410_v29 = vpop.permute.xlu0 %409 }
  0x8c   : > { %v420_v35 = vpop.permute.xlu1 %419 }
  0x8f   : > { %v535_v53 = vpop.permute.xlu0 %534 }
  0x90   : > { %v540_v52 = vpop.permute.xlu1 %539 }
  0x93   : > { %v545_v61 = vpop.permute.xlu0 %544 }
  0x94   : > { %v550_v58 = vpop.permute.xlu1 %549 }
  0xe9   : > { %v999_v30 = vpop.f32.mrb[0].mxu1 }
  0xea   : > { %v507_v31 = vadd.f32 %v999_v30, %v410_v29  ;;  %v501_v32 = vpop.f32.mrb[1].mxu1 }
  0xeb   : > { %v502_v33 = vadd.f32 %v501_v32, %v405_v27  ;;  %v784_v27 = vld [vmem:[%s1334_s7] sm:$0x7f] }
  0xec   : > { %v521_v34 = vmax.f32 %v507_v31, 0.0 }
  0xed   : > { %v520_v36 = vmax.f32 %v502_v33, 0.0  ;;  %v1002_v37 = vpop.f32.mrb[2].mxu1 }
  0xee   : > { %v517_v38 = vadd.f32 %v1002_v37, %v420_v35  ;;  %v511_v39 = vpop.f32.mrb[3].mxu1 }
  0xef   : > { %v1050_v40 = vpack.c.bf16 %v521_v34, %v520_v36  ;;  %v512_v41 = vadd.f32 %v511_v39, %v415_v28  ;;  %v789_v28 = vpop.permute.xlu0 %788 }
  0xf0   : > { %v523_v42 = vmax.f32 %v517_v38, 0.0 }
  0xf1   : > { %v522_v43 = vmax.f32 %v512_v41, 0.0  ;;  %1051 = vmatprep.subr.bf16.mxu1 %v1050_v40 }
  0xf2   : > { %1053 = vmatpush3.bf16.msra.mxu1 %v1050_v40 }
  0xf3   : > { %v1054_v44 = vpack.c.bf16 %v523_v42, %v522_v43 }
  0xf5   : > { %1055 = vmatprep.subr.bf16.mxu1 %v1054_v44 }
  0xf6   : > { %1057 = vmatpush3.bf16.msra.mxu1 %v1054_v44 }
  0xf7   : > { %1074 = vmatprep.subr.bf16.mxu1 %v1136_v4 }
  0xf9   : > { %1012 = vmatmul.mubr.msk.f32.vlgmr.msra.gmra.mrb[4].mxu1 %vm552_vm1, %v525_v45 }
  0xfa   : > { %1014 = vmatprep.mubr.msk.f32.mxu1 %vm552_vm1, %v526_v46 }
  0xfd   : > { %1015 = vmatmul.mubr.msk.f32.gmra.mrb[6].mxu1 %vm552_vm1, %v527_v47 }
  0xfe   : > { %1047 = vmatprep.mubr.msk.f32.mxu1 %vm1137_vm4, %v1135_v51 }
 0x1cc   : > { %v1013_v54 = vpop.f32.mrb[4].mxu1 }
 0x1cd   : > { %v637_v55 = vadd.f32 %v1013_v54, %v540_v52  ;;  %v631_v56 = vpop.f32.mrb[5].mxu1 }
 0x1ce   : > { %v632_v57 = vadd.f32 %v631_v56, %v535_v53 }
 0x1cf   : > { %v651_v62 = vmax.f32 %v637_v55, 0.0 }
 0x1d0   : > { %v650_v59 = vmax.f32 %v632_v57, 0.0  ;;  %v1016_v60 = vpop.f32.mrb[6].mxu1 }
 0x1d1   : > { %v647_v63 = vadd.f32 %v1016_v60, %v550_v58  ;;  %v641_v0 = vpop.f32.mrb[7].mxu1 }
 0x1d2   : > { %v642_v1 = vadd.f32 %v641_v0, %v545_v61  ;;  %1033 = vmatprep.mubr.msk.f32.mxu0 %vm666_vm3, %v650_v59 }
 0x1d3   : > { %1034 = vmatmul.mubr.msk.f32.vlgmr.msra.gmra.mrb[0].mxu0 %vm666_vm3, %v651_v62  ;;  %v653_v3 = vmax.f32 %v647_v63, 0.0 }
 0x1d4   : > { %v652_v2 = vmax.f32 %v642_v1, 0.0 }
 0x1d6   : > { %1036 = vmatprep.mubr.msk.f32.mxu0 %vm666_vm3, %v652_v2 }
 0x1d7   : > { %1037 = vmatmul.mubr.msk.f32.gmra.mrb[2].mxu0 %vm666_vm3, %v653_v3 }
 0x2a6   : > { %v1035_v7 = vpop.f32.mrb[0].mxu0 }
 0x2a7   : > { %v765_v8 = vadd.f32 %v1035_v7, %v655_v5  ;;  %v745_v9 = vpop.f32.mrb[1].mxu0 }
 0x2a8   : > { %v764_v10 = vadd.f32 %v745_v9, %v654_v6 }
 0x2a9   : > { %770 = vst.msk [vmem:[#allocation2 + $0x8] sm:$0xff] %vm380_vm2, %v765_v8 }
 0x2aa   : > { %769 = vst.msk [vmem:[#allocation2] sm:$0xff] %vm380_vm2, %v764_v10  ;;  %v1038_v13 = vpop.f32.mrb[2].mxu0 }
 0x2ab   : > { %v767_v14 = vadd.f32 %v1038_v13, %v657_v11  ;;  %v755_v15 = vpop.f32.mrb[3].mxu0 }
 0x2ac   : > { %v766_v16 = vadd.f32 %v755_v15, %v656_v12 }
 0x2ad   : > { %772 = vst.msk [vmem:[#allocation2 + $0x18] sm:$0xff] %vm380_vm2, %v767_v14 }
 0x2ae   : > { %771 = vst.msk [vmem:[#allocation2 + $0x10] sm:$0xff] %vm380_vm2, %v766_v16 }
 0x2b0   : > { %v777_v17 = vld [vmem:[#allocation2 + $0x8] sm:$0xff] }
 0x2b1   : > { %v776_v18 = vld [vmem:[#allocation2] sm:$0xff]  ;;  %v781_v19 = vmul.f32 0.0625, %v777_v17 }
 0x2b2   : > { %v780_v20 = vmul.f32 0.0625, %v776_v18 }
 0x2b4   : > { %v1075_v21 = vpack.c.bf16 %v781_v19, %v780_v20  ;;  %v779_v22 = vld [vmem:[#allocation2 + $0x18] sm:$0xff] }
 0x2b5   : > { %v778_v23 = vld [vmem:[#allocation2 + $0x10] sm:$0xff]  ;;  %v783_v24 = vmul.f32 0.0625, %v779_v22 }
 0x2b6   : > { %1076 = vmatpush3.bf16.msra.mxu1 %v1075_v21  ;;  %v782_v25 = vmul.f32 0.0625, %v778_v23 }
 0x2b7   : > { %1077 = vmatprep.subr.bf16.mxu1 %v1136_v4 }
 0x2b8   : > { %v1078_v26 = vpack.c.bf16 %v783_v24, %v782_v25 }
 0x2ba   : > { %1079 = vmatpush3.bf16.msra.mxu1 %v1078_v26 }
 0x2bd   : > { %1048 = vmatmul.mubr.msk.f32.vlgmr.msra.gmra.mrb[8].mxu1 %vm552_vm1, %v784_v27 }
 0x390   : > { %v860_v29 = vpop.f32.mrb[8].mxu1 }
 0x391   : > { %v861_v30 = vadd.f32 %v860_v29, %v789_v28  ;;  %v1049_v31 = vpop.f32.mrb[9].mxu1 }
 0x393   : > { %865 = vst.msk [vmem:[%s375_s26] sm:$0x7f] %vm864_vm5, %v861_v30 }
 0x394 PF: > { %s19_s11 = sadd.s32 1, %s1132_s11   ;;  %s1337_s30 = smov %s1128_s10 }
 0x395   : > { %p16_p5 = scmp.ge.s32.totalorder %s19_s11, 4   ;;  %s1338_s10 = smov %s1340_s12 }
 0x397   :  { %18 = sbr.rel (!%p16_p5) target bundleno = 2 (0x2), region = 97 }

</bundles_post_ra>
